<compile_context>
chip_gen: v7x
topology: tpu7x:2x2x1
jax: 0.10.0
libtpu: 0.0.40
codegen_flags: <defaults>
</compile_context>

<pallas_src>
from functools import partial

import jax
import jax.numpy as jnp
from jax.experimental import pallas as pl
from jax.experimental.pallas import tpu as pltpu


# ---------------------------------------------------------------------------
# Tunables (portable defaults; see header for v5e/v6e vs v7x guidance).
# ---------------------------------------------------------------------------
VMEM_LIMIT_BYTES = 32 * 1024 * 1024    # v7x-safe scoped budget (64 MiB physical);
                                       # raise to ~64 MiB on v5e/v6e (128 MiB VMEM).
LINEAR_VMEM_BUDGET = 24 * 1024 * 1024  # resident weight + double-buffered x/out tiles
MAX_ROW_BLOCK = 1024                   # rows per linear grid step upper bound


# ---------------------------------------------------------------------------
# Optional single-buffering of resident (constant-index) blocks.
# ---------------------------------------------------------------------------
_BUFFERED_ONE_OK = None


def _buffered_one_supported():
    """Probe once whether pl.Buffered(1) is accepted on a constant-index BlockSpec."""
    global _BUFFERED_ONE_OK
    if _BUFFERED_ONE_OK is None:
        try:
            def _k(a_ref, o_ref):
                o_ref[...] = a_ref[...] * 2.0

            out = pl.pallas_call(
                _k,
                out_shape=jax.ShapeDtypeStruct((8, 128), jnp.float32),
                grid=(1,),
                in_specs=[pl.BlockSpec((8, 128), lambda i: (0, 0),
                                       pipeline_mode=pl.Buffered(1))],
                out_specs=pl.BlockSpec((8, 128), lambda i: (0, 0)),
            )(jnp.zeros((8, 128), jnp.float32))
            jax.block_until_ready(out)
            _BUFFERED_ONE_OK = True
        except Exception:
            _BUFFERED_ONE_OK = False
    return _BUFFERED_ONE_OK


def _resident_spec(shape):
    """BlockSpec for an operand that stays resident in VMEM (constant block index)."""
    index_map = lambda i: tuple(0 for _ in shape)
    if _buffered_one_supported():
        return pl.BlockSpec(shape, index_map, pipeline_mode=pl.Buffered(1))
    return pl.BlockSpec(shape, index_map)


# ---------------------------------------------------------------------------
# Kernel 1: plain linear  y = x @ Wt + bias   (LoRA + scale already folded into Wt)
# ---------------------------------------------------------------------------
def _linear_kernel(x_ref, wt_ref, b_ref, o_ref):
    y = jnp.dot(x_ref[...], wt_ref[...], preferred_element_type=jnp.float32)
    o_ref[...] = (y + b_ref[...]).astype(o_ref.dtype)


def _pick_row_block(M, K, Nout, in_itemsize, out_itemsize,
                    budget=LINEAR_VMEM_BUDGET, max_rows=MAX_ROW_BLOCK):
    """Largest row tile whose VMEM footprint fits the budget, with >= 2 grid steps
    whenever M allows it (v7x has 2 TensorCores to shard the 'parallel' axis over)."""
    w_bufs = 1 if _buffered_one_supported() else 2
    fixed = w_bufs * K * Nout * in_itemsize + 2 * Nout * 4          # weight + bias
    tm = max_rows
    while tm > 8:
        per_step = 2 * tm * K * in_itemsize + 2 * tm * Nout * out_itemsize
        if fixed + per_step <= budget:
            break
        tm //= 2
    tm = min(tm, M)
    if M >= 16 and pl.cdiv(M, tm) < 2:
        tm = max(8, ((M // 2) + 7) // 8 * 8)     # partial last block is masked by Pallas
    return tm


def linear_pallas(x2d, w_t, bias, *, out_dtype=None, vmem_limit=VMEM_LIMIT_BYTES):
    """x2d: (M, K), w_t: (K, Nout) pre-transposed, bias: (1, Nout) f32 -> (M, Nout)."""
    M, K = x2d.shape
    Kw, Nout = w_t.shape
    assert K == Kw
    out_dtype = out_dtype or x2d.dtype
    tm = _pick_row_block(M, K, Nout,
                         jnp.dtype(x2d.dtype).itemsize, jnp.dtype(out_dtype).itemsize)
    return pl.pallas_call(
        _linear_kernel,
        out_shape=jax.ShapeDtypeStruct((M, Nout), out_dtype),
        grid=(pl.cdiv(M, tm),),
        in_specs=[
            pl.BlockSpec((tm, K), lambda i: (i, 0)),   # pipelined row tile of x
            _resident_spec((K, Nout)),                 # weight resident in VMEM
            _resident_spec((1, Nout)),                 # bias resident in VMEM
        ],
        out_specs=pl.BlockSpec((tm, Nout), lambda i: (i, 0)),
        compiler_params=pltpu.CompilerParams(
            dimension_semantics=("parallel",),         # megacore over row tiles
            vmem_limit_bytes=vmem_limit,
        ),
    )(x2d, w_t, bias)


# ---------------------------------------------------------------------------
# Kernel 2: attention core — one batch element per grid step, all heads in-block.
#   Input block:  (1, N, 3C) slice of the fused qkv projection (q | k | v columns).
#   Output block: (1, N, C) directly in the MERGED head layout (lane-dense store).
#   Per-head q/k/v are static lane slices; the loop is over a compile-time constant
#   head count (kept as a loop rather than an in-kernel (N,C)->(N,H,D) relayout so
#   the layouts stay simple for Mosaic and the MXU sees plain 2-D matmuls).
# ---------------------------------------------------------------------------
def _attn_kernel(num_heads, head_dim, qkv_ref, o_ref):
    C = num_heads * head_dim
    outs = []
    for h in range(num_heads):                      # static unrolled loop
        lo = h * head_dim
        qh = qkv_ref[0, :, lo:lo + head_dim]                    # (N, D); scale pre-folded
        kh = qkv_ref[0, :, C + lo:C + lo + head_dim]            # (N, D)
        vh = qkv_ref[0, :, 2 * C + lo:2 * C + lo + head_dim]    # (N, D)
        s = jnp.einsum("qd,kd->qk", qh, kh,
                       preferred_element_type=jnp.float32)      # (N, N) f32 scores
        s = s - jnp.max(s, axis=-1, keepdims=True)              # stable softmax
        p = jnp.exp(s)
        denom = jnp.sum(p, axis=-1, keepdims=True)
        oh = jnp.dot(p.astype(vh.dtype), vh,                    # bf16 MXU path
                     preferred_element_type=jnp.float32)        # (N, D)
        # Deferred normalization: scale N*D elements instead of N*N (EUP reciprocal).
        oh = oh * pl.reciprocal(denom, approx=True)
        outs.append(oh)
    # Single lane-dense store in the merged (N, C) layout.
    o_ref[0] = jnp.concatenate(outs, axis=-1).astype(o_ref.dtype)
    # TODO(synk): for very long sequences (N >~ 1-2K) the (N, N) score tiles and the
    # (N, 3C) block stop fitting the VMEM budget; switch to a KV-tiled online-softmax
    # (flash) grid with an "arbitrary" last axis. Not needed for ViT-scale N.


def attn_core(qkv3, num_heads, *, out_dtype, vmem_limit=VMEM_LIMIT_BYTES):
    """qkv3: (B, N, 3C) fused q|k|v projections. Returns merged (B, N, C)."""
    B, N, C3 = qkv3.shape
    C = C3 // 3
    head_dim = C // num_heads
    return pl.pallas_call(
        partial(_attn_kernel, num_heads, head_dim),
        out_shape=jax.ShapeDtypeStruct((B, N, C), out_dtype),
        grid=(B,),                                   # >= 2 steps whenever B >= 2 (v7x)
        in_specs=[pl.BlockSpec((1, N, C3), lambda b: (b, 0, 0))],
        out_specs=pl.BlockSpec((1, N, C), lambda b: (b, 0, 0)),
        compiler_params=pltpu.CompilerParams(
            dimension_semantics=("parallel",),
            vmem_limit_bytes=vmem_limit,
        ),
    )(qkv3)


# ---------------------------------------------------------------------------
# Weight preparation (XLA, setup-time): LoRA fold in f32, scale fold, bf16 cast.
# ---------------------------------------------------------------------------
def _fold_lora(p, extra_scale=1.0):
    """(W + scaling * B @ A) * extra_scale  in f32; bias scaled identically."""
    w = (p["w"] + p["scaling"] * (p["B"] @ p["A"])) * extra_scale   # (out, in) f32
    b = p["bias"] * extra_scale                                     # (1, out) f32
    return w, b


# ---------------------------------------------------------------------------
# Full Attention forward
# ---------------------------------------------------------------------------
def attention_forward(x, params, num_heads, *, compute_dtype=jnp.bfloat16):
    B, N, C = x.shape
    head_dim = C // num_heads
    assert head_dim * num_heads == C
    scale = head_dim ** (-0.5)

    # Fused q|k|v weight: LoRA folded in f32, head_dim**-0.5 folded into the q slice,
    # pre-transposed to (in, 3*out), then cast to bf16 for the MXU.
    wq, bq = _fold_lora(params["q"], scale)
    wk, bk = _fold_lora(params["k"])
    wv, bv = _fold_lora(params["v"])
    w_qkv_t = jnp.concatenate([wq, wk, wv], axis=0).T.astype(compute_dtype)  # (C, 3C)
    b_qkv = jnp.concatenate([bq, bk, bv], axis=-1)                           # (1, 3C) f32

    wp, bp = _fold_lora(params["proj"])
    w_p_t = wp.T.astype(compute_dtype)                                       # (C, C)

    x2d = x.reshape(B * N, C).astype(compute_dtype)

    # One fused projection: x is streamed from HBM once for q, k and v.
    qkv = linear_pallas(x2d, w_qkv_t, b_qkv, out_dtype=compute_dtype)        # (B*N, 3C)
    qkv3 = qkv.reshape(B, N, 3 * C)                                          # free reshape

    # Attention core reads the fused layout directly and writes the merged layout
    # directly -> no head split/merge transposes, lane-dense output stores.
    attn_out = attn_core(qkv3, num_heads, out_dtype=compute_dtype)           # (B, N, C)

    out = linear_pallas(attn_out.reshape(B * N, C), w_p_t, bp, out_dtype=x.dtype)
    return out.reshape(B, N, C)


# ---------------------------------------------------------------------------
# Pure-JAX reference (unfused LoRA path, matches the PyTorch forward exactly, f32)
# ---------------------------------------------------------------------------
def attention_reference(x, params, num_heads):
    B, N, C = x.shape
    head_dim = C // num_heads
    scale = head_dim ** (-0.5)

    def lora_lin(t2d, p):
        base = t2d @ p["w"].T + p["bias"]
        return base + (t2d @ p["A"].T) @ p["B"].T * p["scaling"]

    x2d = x.reshape(B * N, C)
    q = lora_lin(x2d, params["q"])
    k = lora_lin(x2d, params["k"])
    v = lora_lin(x2d, params["v"])

    def split(t):
        return (
            t.reshape(B, N, num_heads, head_dim)
            .transpose(0, 2, 1, 3)
            .reshape(B * num_heads, N, head_dim)
        )

    qh, kh, vh = split(q), split(k), split(v)
    s = jnp.einsum("bnd,bmd->bnm", qh, kh) * scale
    p_attn = jax.nn.softmax(s, axis=-1)
    o = jnp.einsum("bnm,bmd->bnd", p_attn, vh)
    o = (
        o.reshape(B, num_heads, N, head_dim)
        .transpose(0, 2, 1, 3)
        .reshape(B * N, C)
    )
    out = lora_lin(o, params["proj"])
    return out.reshape(B, N, C)


# ---------------------------------------------------------------------------
# Deterministic parameter construction (shapes from Attention.__init__)
# ---------------------------------------------------------------------------
def make_params(key, dim, rank, lora_alpha=1, qkv_bias=False):
    scaling = lora_alpha / rank
    names = ["q", "k", "v", "proj"]
    params = {}
    for i, name in enumerate(names):
        kw, ka, kb, kbias = jax.random.split(jax.random.fold_in(key, i), 4)
        has_bias = (name == "proj") or qkv_bias   # q/k/v: bias=qkv_bias; proj: bias=True
        params[name] = {
            "w": jax.random.normal(kw, (dim, dim), jnp.float32) * 0.05,
            "A": jax.random.normal(ka, (rank, dim), jnp.float32) * 0.05,
            # NOTE: torch init zeroes lora_B; non-zero here so the LoRA path is
            # actually exercised (semantics identical).
            "B": jax.random.normal(kb, (dim, rank), jnp.float32) * 0.05,
            "bias": (
                jax.random.normal(kbias, (1, dim), jnp.float32) * 0.05
                if has_bias
                else jnp.zeros((1, dim), jnp.float32)
            ),
            "scaling": scaling,
        }
    return params


if __name__ == "__main__":
    B, N, C = 2, 8, 32
    num_heads = 8          # head_dim = 4
    rank = 4

    key = jax.random.PRNGKey(0)
    kx, kp = jax.random.split(key)
    x = jax.random.normal(kx, (B, N, C), jnp.float32)
    params = make_params(kp, C, rank)

    out = attention_forward(x, params, num_heads)
    out = jax.block_until_ready(out)

    ref = attention_reference(x, params, num_heads)
    assert out.shape == (B, N, C)
    # Tolerance covers bf16 matmul inputs (f32 accumulation) and the EUP approximate
    # reciprocal in the softmax; structural errors would be orders of magnitude larger.
    max_err = jnp.max(jnp.abs(out - ref))
    assert jnp.allclose(out, ref, atol=2e-2, rtol=2e-2), f"max abs err {max_err}"

    print("KERNEL_OK")
</pallas_src>

<mosaic_0001>
module attributes {stable_mosaic.version = 11 : i64} {
  func.func @_k(%arg0: i32, %arg1: memref<8x128xf32, #tpu.memory_space<vmem>>, %arg2: memref<8x128xf32, #tpu.memory_space<vmem>>) attributes {dimension_semantics = [#tpu.dimension_semantics<arbitrary>], iteration_bounds = array<i64: 1>, scalar_prefetch = 0 : i64, scratch_operands = 0 : i64, tpu.core_type = #tpu.core_type<tc>, window_params = [{pipeline_mode = #tpu.pipeline_mode<synchronous>, transform_indices = @transform_0, window_bounds = array<i64: 8, 128>}, {pipeline_mode = #tpu.pipeline_mode<synchronous>, transform_indices = @transform_1, window_bounds = array<i64: 8, 128>}]} {
    %c0 = arith.constant 0 : index
    %c0_0 = arith.constant 0 : index
    %0 = vector.load %arg1[%c0, %c0_0] : memref<8x128xf32, #tpu.memory_space<vmem>>, vector<8x128xf32>
    %cst = arith.constant 2.000000e+00 : f32
    %1 = vector.broadcast %cst : f32 to vector<8x128xf32>
    %2 = arith.mulf %0, %1 : vector<8x128xf32>
    %c0_1 = arith.constant 0 : index
    %c0_2 = arith.constant 0 : index
    %3 = vector.load %arg2[%c0_1, %c0_2] : memref<8x128xf32, #tpu.memory_space<vmem>>, vector<8x128xf32>
    tpu.vector_store %arg2[%c0_1, %c0_2], %2 {strides = array<i32>} : memref<8x128xf32, #tpu.memory_space<vmem>>, vector<8x128xf32>,
    return
  }
  func.func @transform_0(%arg0: i32) -> (i32, i32) {
    %c0_i32 = arith.constant 0 : i32
    %c0_i32_0 = arith.constant 0 : i32
    %c0_i32_1 = arith.constant 0 : i32
    return %c0_i32, %c0_i32_0 : i32, i32
  }
  func.func @transform_1(%arg0: i32) -> (i32, i32) {
    %c0_i32 = arith.constant 0 : i32
    %c0_i32_0 = arith.constant 0 : i32
    %c0_i32_1 = arith.constant 0 : i32
    return %c0_i32, %c0_i32_0 : i32, i32
  }
}

module attributes {stable_mosaic.version = 11 : i64} {
  func.func @_linear_kernel(%arg0: i32, %arg1: memref<8x32xbf16, #tpu.memory_space<vmem>>, %arg2: memref<32x96xbf16, #tpu.memory_space<vmem>>, %arg3: memref<1x96xf32, #tpu.memory_space<vmem>>, %arg4: memref<8x96xbf16, #tpu.memory_space<vmem>>) attributes {dimension_semantics = [#tpu.dimension_semantics<parallel>], iteration_bounds = array<i64: 2>, scalar_prefetch = 0 : i64, scratch_operands = 0 : i64, tpu.core_type = #tpu.core_type<tc>, window_params = [{transform_indices = @transform_0, window_bounds = array<i64: 8, 32>}, {pipeline_mode = #tpu.pipeline_mode<synchronous>, transform_indices = @transform_1, window_bounds = array<i64: 32, 96>}, {pipeline_mode = #tpu.pipeline_mode<synchronous>, transform_indices = @transform_2, window_bounds = array<i64: 1, 96>}, {transform_indices = @transform_3, window_bounds = array<i64: 8, 96>}]} {
    %c0 = arith.constant 0 : index
    %c0_0 = arith.constant 0 : index
    %0 = vector.load %arg1[%c0, %c0_0] : memref<8x32xbf16, #tpu.memory_space<vmem>>, vector<8x32xbf16>
    %c0_1 = arith.constant 0 : index
    %c0_2 = arith.constant 0 : index
    %1 = vector.load %arg2[%c0_1, %c0_2] : memref<32x96xbf16, #tpu.memory_space<vmem>>, vector<32x96xbf16>
    %cst = arith.constant dense<0.000000e+00> : vector<8x96xf32>
    %2 = tpu.matmul %0, %1, %cst {dimension_numbers = #tpu.dot_dimension_numbers<[1], [0], [0], [1], [0, 0, 1, 1], [], []>} : vector<8x32xbf16>, vector<32x96xbf16>, vector<8x96xf32> -> vector<8x96xf32>
    %c0_3 = arith.constant 0 : index
    %c0_4 = arith.constant 0 : index
    %3 = vector.load %arg3[%c0_3, %c0_4] : memref<1x96xf32, #tpu.memory_space<vmem>>, vector<1x96xf32>
    %4 = vector.broadcast %3 : vector<1x96xf32> to vector<8x96xf32>
    %5 = arith.addf %2, %4 : vector<8x96xf32>
    %6 = arith.truncf %5 : vector<8x96xf32> to vector<8x96xbf16>
    %c0_5 = arith.constant 0 : index
    %c0_6 = arith.constant 0 : index
    %7 = vector.load %arg4[%c0_5, %c0_6] : memref<8x96xbf16, #tpu.memory_space<vmem>>, vector<8x96xbf16>
    tpu.vector_store %arg4[%c0_5, %c0_6], %6 {strides = array<i32>} : memref<8x96xbf16, #tpu.memory_space<vmem>>, vector<8x96xbf16>,
    return
  }
  func.func @transform_0(%arg0: i32) -> (i32, i32) {
    %c0_i32 = arith.constant 0 : i32
    %c0_i32_0 = arith.constant 0 : i32
    return %arg0, %c0_i32 : i32, i32
  }
  func.func @transform_1(%arg0: i32) -> (i32, i32) {
    %c0_i32 = arith.constant 0 : i32
    %c0_i32_0 = arith.constant 0 : i32
    %c0_i32_1 = arith.constant 0 : i32
    return %c0_i32, %c0_i32_0 : i32, i32
  }
  func.func @transform_2(%arg0: i32) -> (i32, i32) {
    %c0_i32 = arith.constant 0 : i32
    %c0_i32_0 = arith.constant 0 : i32
    %c0_i32_1 = arith.constant 0 : i32
    return %c0_i32, %c0_i32_0 : i32, i32
  }
  func.func @transform_3(%arg0: i32) -> (i32, i32) {
    %c0_i32 = arith.constant 0 : i32
    %c0_i32_0 = arith.constant 0 : i32
    return %arg0, %c0_i32 : i32, i32
  }
}

</mosaic_0001>

<bundles_post_ra>
// kernel: tpu_custom_call.1
= control target key start
LH: loop header
LB: loop body
LE: loop exit
PB: predicated region body
PF: predicated region fallthrough
CT: control target
= control target key end

     0   :  { %6 = vsyncpa [#allocation3], 0  ;;  %s125_s0 = inlined_call_operand.hbm [shape: f32[8,128], index: 0, kind: input, shape index: {}]   ;;  %s126_s1 = inlined_call_operand.hbm [shape: f32[8,128], index: 1, kind: output, shape index: {}]  }
   0x1   :  { %7 = vsyncpa [#allocation4], 0  ;;  %s89_s6 = smov [#allocation2]   ;;  %s41_s10 = scalar_lea.hbm %s125_s0, 128 }
   0x2   :  { %s14_s7 = sshll.u32 %s89_s6, 4  ;;  %p42_p0 = scmp.ne.s32.totalorder %s125_s0, %s41_s10  ;;  %s15_s7 = int_to_ptr.vmem [resolvable:$true] %s14_s7 }
   0x3   :  { %p45_p1 = scmp.lt.u32.totalorder %s41_s10, %s125_s0 }
   0x5   :  { %p47_p2 = pnand %p45_p1, %p42_p0 }
   0x7   :  { %50 = shalt.err (!%p47_p2)
}
   0x8   :  { %s51_s15 = scalar_lea.vmem %s15_s7, 128  ;;  %p56_p4 = scmp.lt.s32.totalorder %s15_s7, %s15_s7 }
   0x9   :  { %p52_p3 = scmp.ne.s32.totalorder %s15_s7, %s51_s15  ;;  %p57_p5 = scmp.lt.s32.totalorder %s51_s15, %s51_s15 }
   0xb   :  { %p58_p6 = por %p57_p5, %p56_p4 }
   0xd   :  { %p59_p7 = pnand %p58_p6, %p52_p3 }
   0xf   :  { %62 = shalt.err (!%p59_p7)
}
  0x10   :  { %17 = dma.hbm_to_vmem [thread:$0]  %s125_s0, 128, %s15_s7, [#allocation3]  }
  0x11   :  { %85 = dma.done.wait [#allocation3], 128  }
  0x12   :  { %86 = vsyncadd [#allocation3], 4294967168  ;;  %s90_s18 = smov [#allocation5]   ;;  %v21_v0 = vld [vmem:[#allocation2] sm:$0xff] }
  0x13   :  { %s30_s19 = sshll.u32 %s90_s18, 4  ;;  %v22_v1 = vmul.f32 2.0, %v21_v0  ;;  %s31_s19 = int_to_ptr.vmem [resolvable:$true] %s30_s19 }
  0x14   :  { %s63_s20 = scalar_lea.vmem %s31_s19, 128  ;;  %p68_p9 = scmp.lt.s32.totalorder %s31_s19, %s31_s19 }
  0x15   :  { %23 = vst [vmem:[#allocation5] sm:$0xff] %v22_v1  ;;  %p64_p8 = scmp.ne.s32.totalorder %s31_s19, %s63_s20  ;;  %p69_p10 = scmp.lt.s32.totalorder %s63_s20, %s63_s20 }
  0x17   :  { %p70_p11 = por %p69_p10, %p68_p9 }
  0x19   :  { %p71_p12 = pnand %p70_p11, %p64_p8 }
  0x1b   :  { %74 = shalt.err (!%p71_p12)
}
  0x1c   :  { %s75_s23 = scalar_lea.hbm %s126_s1, 128 }
  0x1d   :  { %p76_p13 = scmp.ne.s32.totalorder %s126_s1, %s75_s23  ;;  %p79_p0 = scmp.lt.u32.totalorder %s75_s23, %s126_s1 }
  0x1f   :  { %p81_p1 = pnand %p79_p0, %p76_p13 }
  0x21   :  { %84 = shalt.err (!%p81_p1)
}
  0x22   :  { %33 = dma.vmem_to_hbm [thread:$0]  %s31_s19, 128, %s126_s1, [#allocation4]  }
  0x23   :  { %87 = dma.done.wait [#allocation4], 128  }
  0x24   :  { %88 = vsyncadd [#allocation4], 4294967168 }
  0x25   :  { %37 = vsyncpa [#allocation3], 1 }
  0x26   :  { %38 = vsyncpa [#allocation4], 1 }

// kernel: tpu_custom_call.1
= control target key start
LH: loop header
LB: loop body
LE: loop exit
PB: predicated region body
PF: predicated region fallthrough
CT: control target
= control target key end

     0   :  { %8 = vsyncpa [#allocation3], 0  ;;  %s815_s0 = inlined_call_operand.hbm [shape: bf16[16,32], index: 0, kind: input, shape index: {}]   ;;  %s816_s1 = inlined_call_operand.hbm [shape: bf16[32,96], index: 1, kind: input, shape index: {}]   ;;  %s817_s2 = inlined_call_operand.vmem [shape: f32[1,96], index: 2, kind: input, shape index: {}]   ;;  %s818_s3 = inlined_call_operand.hbm [shape: bf16[16,96], index: 3, kind: output, shape index: {}]  }
   0x1   :  { %10 = vsyncpa [#allocation3 + $0x1], 0 }
   0x2   :  { %11 = vsyncpa [#allocation6], 0 }
   0x3   :  { %12 = vsyncpa [#allocation4], 0 }
   0x4   :  { %14 = vsyncpa [#allocation4 + $0x1], 0  ;;  %s616_s12 = smov 0   ;;  %s618_s13 = smov 0  }
   0x5   :  { %s620_s14 = smov 0   ;;  %s622_s15 = smov 0  }
   0x6 LB: > { %s637_s16 = sadd.s32 4294967295, %s587_s15   ;;  %s367_s17 = sadd.s32 4294967294, %s587_s15   ;;  %s587_s15 = sphi %s622_s15, %s838_s15   ;;  %s583_s14 = sphi %s620_s14, %s837_s14   ;;  %s579_s13 = sphi %s618_s13, %s836_s13   ;;  %s575_s12 = sphi %s616_s12, %s835_s12  }
   0x7   : > { %p40_p0 = scmp.ne.s32.totalorder %s579_s13, %s575_s12  ;;  %p819_p1 = scmp.eq.s32.totalorder %s637_s16, 0 }
   0x8   : > { %p112_p3 = scmp.eq.s32.totalorder %s367_s17, 1  ;;  %p368_p5 = scmp.ge.s32.totalorder %s587_s15, 1 }
   0x9   : > { %p646_p4 = por %p819_p1, %p40_p0  ;;  %p119_p7 = scmp.lt.s32.totalorder %s587_s15, 3 }
   0xa   : > { %p651_p6 = por %p112_p3, %p40_p0  ;;  %s589_s21 = smov [#allocation5]  }
   0xb   : > { %s822_s18 = scalar_select %p646_p4, 1, 0 }
   0xc   : > { %s823_s19 = scalar_select %p651_p6, 1, 0 }
   0xd   : > { %p656_p8 = pnand %p368_p5, %p119_p7  ;;  %s131_s22 = sshll.u32 %s589_s21, 4  ;;  %s660_s22 = int_to_ptr.vmem [resolvable:$true] %s131_s22 }
   0xe   : > { %s672_s24 = sadd.s32 1, %s587_s15   ;;  %s27_s25 = sadd.s32 1, %s583_s14 }
   0xf   : > { %s824_s20 = scalar_select %p656_p8, 1, 0 }
  0x10   : > { %p404_p9 = pneg %p656_p8  ;;  %s24_s26 = ssub.s32 %s587_s15, %s672_s24 }
  0x11   : > { %s459_s29 = scalar_lea.hbm %s816_s1, 256 }
  0x12   : > { %p667_p11 = pnand %p404_p9, %p819_p1  ;;  %p460_p12 = scmp.ne.s32.totalorder %s816_s1, %s459_s29 }
  0x13   : > { %p466_p5 = scmp.lt.u32.totalorder %s459_s29, %s816_s1 }
  0x14   : > { %p461_p13 = pneg %p667_p11 }
  0x16   : > { %p462_p0 = pnand %p461_p13, %p460_p12 }
  0x18   : > { %p463_p3 = pneg %p462_p0 }
  0x1a   : > { %p468_p7 = pnand %p466_p5, %p463_p3 }
  0x1c   : > { %471 = shalt.err (!%p468_p7)
}
  0x1d   : > { %s472_s7 = scalar_lea.vmem %s660_s22, 256  ;;  %p480_p2 = scmp.lt.s32.totalorder %s660_s22, %s660_s22 }
  0x1e   : > { %p473_p9 = scmp.ne.s32.totalorder %s660_s22, %s472_s7  ;;  %p481_p6 = scmp.lt.s32.totalorder %s472_s7, %s472_s7 }
  0x20   : > { %p475_p10 = pnand %p473_p9, %p461_p13  ;;  %p482_p4 = por %p481_p6, %p480_p2 }
  0x22   : > { %p476_p1 = pneg %p475_p10 }
  0x24   : > { %p483_p8 = pnand %p482_p4, %p476_p1 }
  0x26   : > { %486 = shalt.err (!%p483_p8)
}
  0x27   : > { %s590_s8 = smov 64   ;;  %s591_s9 = smov 4  }
  0x28   : > { %407 = dma.hbm_to_vmem [thread:$0]  (!%p667_p11), %s816_s1, 256, %s660_s22, [#allocation6], %s590_s8, %s590_s8, %s591_s9  }
  0x29   : > { %p25_p2 = scmp.eq.s32.totalorder %s24_s26, 0  ;;  %p34_p1 = scmp.ne.s32.totalorder %s583_s14, %s579_s13 }
  0x2a   : > { %p35_p4 = scmp.eq.s32.totalorder %s587_s15, 0  ;;  %p417_p6 = scmp.lt.s32.totalorder %s587_s15, 2 }
  0x2b   : > { %s703_s17 = scalar_select %p25_p2, %s583_s14, %s27_s25  }
  0x2c   : > { %p36_p8 = por %p35_p4, %p34_p1  ;;  %p826_p10 = scmp.eq.s32.totalorder %s637_s16, 1 }
  0x2d   : > { %s148_s27 = sand.u32 1, %s583_s14   ;;  %s372_s28 = sshll.u32 %s587_s15, 6 }
  0x2e   : > { %p707_p12 = por %p826_p10, %p34_p1  ;;  %s371_s29 = sshll.u32 %s148_s27, 2 }
  0x2f   : > { %s716_s4 = scalar_lea.hbm %s815_s0, %s372_s28  ;;  %s152_s22 = scalar_lea.vmem [#allocation2], %s371_s29 }
  0x30   : > { %s159_s25 = sshll.u32 %s152_s22, 4  ;;  %p718_p11 = pnand %p417_p6, %p36_p8  ;;  %s722_s25 = int_to_ptr.vmem [resolvable:$true] %s159_s25 }
  0x31   : > { %s149_s5 = scalar_lea.sflag [#allocation3], %s148_s27  ;;  %s487_s6 = scalar_lea.hbm %s716_s4, 64 }
  0x32   : > { %p488_p13 = scmp.ne.s32.totalorder %s716_s4, %s487_s6  ;;  %p489_p0 = pneg %p718_p11 }
  0x33   : > { %s492_s9 = scalar_lea.hbm %s815_s0, 128  ;;  %p493_p7 = scmp.lt.u32.totalorder %s716_s4, %s815_s0 }
  0x34   : > { %p490_p3 = pnand %p489_p0, %p488_p13  ;;  %p494_p9 = scmp.lt.u32.totalorder %s492_s9, %s487_s6 }
  0x35   : > { %p496_p1 = scmp.lt.u32.totalorder %s487_s6, %s716_s4 }
  0x36   : > { %p491_p5 = pneg %p490_p3  ;;  %p495_p2 = por %p494_p9, %p493_p7 }
  0x38   : > { %p497_p4 = por %p496_p1, %p495_p2 }
  0x3a   : > { %p498_p6 = pnand %p497_p4, %p491_p5 }
  0x3c   : > { %501 = shalt.err (!%p498_p6)
}
  0x3d   : > { %s502_s27 = scalar_lea.vmem %s722_s25, 64  ;;  %s592_s28 = smov [#allocation2]  }
  0x3e   : > { %p503_p8 = scmp.ne.s32.totalorder %s722_s25, %s502_s27  ;;  %s507_s29 = sshll.u32 %s592_s28, 4  ;;  %s508_s29 = int_to_ptr.vmem [resolvable:$false] %s507_s29 }
  0x3f   : > { %s509_s23 = scalar_lea.vmem %s508_s29, 128  ;;  %p510_p3 = scmp.lt.s32.totalorder %s722_s25, %s508_s29 }
  0x40   : > { %p505_p10 = pnand %p503_p8, %p489_p0  ;;  %p511_p7 = scmp.lt.s32.totalorder %s509_s23, %s502_s27 }
  0x42   : > { %p506_p13 = pneg %p505_p10  ;;  %p512_p9 = por %p511_p7, %p510_p3 }
  0x44   : > { %p513_p2 = pnand %p512_p9, %p506_p13 }
  0x46   : > { %516 = shalt.err (!%p513_p2)
}
  0x47   : > { %411 = dma.hbm_to_vmem [thread:$0]  (!%p718_p11), %s716_s4, 64, %s722_s25, %s149_s5  }
  0x48   : > { %p829_p5 = scmp.ne.s32.totalorder %s824_s20, 0 }
  0x49   : > { %s752_s30 = sand.u32 (!%p829_p5), 1, %s579_s13   ;;  %p830_p0 = scmp.ne.s32.totalorder (!%p829_p5), %s822_s18, 0 }
  0x4a   : > { %168 = sbr.rel (%p829_p5) target bundleno = 324 (0x144), region = 32  ;;  %s374_s22 = sshll.u32 (!%p829_p5), %s752_s30, 2 }
  0x4b   : > { %s171_s6 = scalar_lea.sflag (!%p829_p5), [#allocation3], %s752_s30  ;;  %s174_s7 = scalar_lea.vmem (!%p829_p5), [#allocation2], %s374_s22 }
  0x51   : > { %562 = dma.done.wait (%p830_p0), %s171_s6, 64  }
  0x52   : > { %564 = vsyncadd (%p830_p0), %s171_s6, 4294967232  ;;  %p831_p1 = scmp.eq.s32.totalorder %s637_s16, 0 }
  0x54   : > { %566 = dma.done.wait (%p831_p1), [#allocation6], 256   ;;  %p832_p11 = pmov %p831_p1 }
  0x55   : > { %v593_v0 = vmov 0.0   ;;  %vm594_vm0 = vmmov 0   ;;  %v457_v1 = vld [vmem:[#allocation5] sm:$0xff]   ;;  %v458_v2 = vld [vmem:[#allocation5 + $0x8] sm:$0xff]   ;;  %v202_v3 = vld [vmem:[%s174_s7] sm:$0xf] }
  0x56   : > { %568 = vsyncadd (%p832_p11), [#allocation6], 4294967040  ;;  %388 = vmatprep.subr.bf16.mxu0 %v593_v0  ;;  %392 = vmatprep.mubr.msk.bf16.mxu0 %vm594_vm0, %v593_v0  ;;  %vm226_vm1 = vcmask 261120   ;;  %v377_v4 = vld [vmem:[%s817_s2] ss:$0 sm:$0xff]  ;;  %s382_s4 = sshll.u32 %s637_s16, 6 }
  0x57   : > { %389 = vmatpush3.bf16.msra.mxu0 %v457_v1  ;;  %s200_s25 = scalar_lea.vmem [#allocation7], %s374_s22  ;;  %vm271_vm2 = vcmask 781312   ;;  %s771_s9 = scalar_lea.hbm %s818_s3, %s382_s4 }
  0x58   : > { %390 = vmatprep.subr.bf16.mxu0 %v593_v0  ;;  %s287_s26 = sshll.u32 %s200_s25, 4  ;;  %s274_s16 = scalar_lea.sflag [#allocation4], %s752_s30  ;;  %s773_s26 = int_to_ptr.vmem [resolvable:$true] %s287_s26 }
  0x59   : > { %s517_s10 = scalar_lea.vmem %s773_s26, 64  ;;  %s595_s11 = smov [#allocation7]  }
  0x5a   : > { %p518_p4 = scmp.ne.s32.totalorder %s773_s26, %s517_s10  ;;  %s521_s27 = sshll.u32 %s595_s11, 4  ;;  %s522_s27 = int_to_ptr.vmem [resolvable:$false] %s521_s27 }
  0x5b   : > { %391 = vmatpush3.bf16.msra.mxu0 %v458_v2  ;;  %s523_s28 = scalar_lea.vmem %s522_s27, 128  ;;  %p524_p10 = scmp.lt.s32.totalorder %s773_s26, %s522_s27 }
  0x5c   : > { %p519_p6 = pnand %p518_p4, %p707_p12  ;;  %p525_p13 = scmp.lt.s32.totalorder %s523_s28, %s517_s10 }
  0x5e   : > { %393 = vmatmul.mubr.msk.bf16.vlgmr.msra.gmra.mrb[0].mxu0 %vm226_vm1, %v202_v3  ;;  %p520_p8 = pneg %p519_p6  ;;  %p526_p3 = por %p525_p13, %p524_p10 }
  0x60   : > { %p527_p7 = pnand %p526_p3, %p520_p8 }
 0x131   : > { %v264_v5 = vpop.f32.mrb[0].mxu0 }
 0x132   : > { %v265_v6 = vadd.f32 %v377_v4, %v264_v5  ;;  %v394_v7 = vpop.f32.mrb[1].mxu0 }
 0x133   : > { %v267_v8 = vpop.f32.mrb[2].mxu0 }
 0x134   : > { %v270_v9 = vpack.c.bf16 %v265_v6, %v265_v6  ;;  %v395_v10 = vpop.f32.mrb[3].mxu0 }
 0x136   : > { %272 = vst.msk [vmem:[%s200_s25] sm:$0xf] %vm271_vm2, %v270_v9 }
 0x137   : > { %530 = shalt.err (!%p527_p7)
}
 0x138   : > { %s531_s29 = scalar_lea.hbm %s771_s9, 64  ;;  %s535_s22 = scalar_lea.hbm %s818_s3, 128 }
 0x139   : > { %p532_p9 = scmp.ne.s32.totalorder %s771_s9, %s531_s29  ;;  %p536_p0 = scmp.lt.u32.totalorder %s771_s9, %s818_s3 }
 0x13a   : > { %p537_p1 = scmp.lt.u32.totalorder %s535_s22, %s531_s29  ;;  %p539_p4 = scmp.lt.u32.totalorder %s531_s29, %s771_s9 }
 0x13b   : > { %p533_p2 = pnand %p532_p9, %p707_p12 }
 0x13c   : > { %p538_p11 = por %p537_p1, %p536_p0 }
 0x13d   : > { %p534_p5 = pneg %p533_p2 }
 0x13e   : > { %p540_p6 = por %p539_p4, %p538_p11 }
 0x140   : > { %p541_p8 = pnand %p540_p6, %p534_p5 }
 0x142   : > { %544 = shalt.err (!%p541_p8)
}
 0x143   : > { %402 = dma.vmem_to_hbm [thread:$0]  (%p707_p12), %s773_s26, 64, %s771_s9, %s274_s16  }
 0x144 PF: > { %s299_s18 = sand.u32 1, %s575_s12   ;;  %p833_p10 = scmp.ne.s32.totalorder %s823_s19, 0 }
 0x145   : > { %p834_p13 = scmp.ge.s32.totalorder %s587_s15, 2  ;;  %s300_s20 = scalar_lea.sflag [#allocation4], %s299_s18 }
 0x147   : > { %p413_p3 = pnand %p834_p13, %p833_p10 }
 0x149   : > { %570 = dma.done.wait (!%p413_p3), %s300_s20, 64  }
 0x14a   : > { %572 = vsyncadd (!%p413_p3), %s300_s20, 4294967232  ;;  %p17_p7 = scmp.ge.s32.totalorder %s672_s24, 4   ;;  %s835_s12 = smov %s579_s13 }
 0x14b   : > { %s836_s13 = smov %s583_s14  ;;  %s837_s14 = smov %s703_s17 }
 0x14c   : > { %s838_s15 = smov %s672_s24  ;;  %19 = sbr.rel (!%p17_p7) target bundleno = 6 (0x6), region = 81 }
 0x153   :  { %305 = vsyncpa [#allocation3], 1 }
 0x154   :  { %307 = vsyncpa [#allocation3 + $0x1], 1 }
 0x155   :  { %308 = vsyncpa [#allocation6], 1 }
 0x156   :  { %309 = vsyncpa [#allocation4], 1 }
 0x157   :  { %311 = vsyncpa [#allocation4 + $0x1], 1 }

</bundles_post_ra>
